<compile_context>
chip_gen: v7x
topology: tpu7x:2x2x1
jax: 0.10.0
libtpu: 0.0.40
codegen_flags: <defaults>
</compile_context>

<pallas_src>
import jax
import jax.numpy as jnp
from jax import lax
from jax.experimental import pallas as pl
from jax.experimental.pallas import tpu as pltpu


def classblock_kernel(x_ref, w1_ref, b1_ref, w2_ref, b2_ref, o_ref):
    # ---- Linear1 (BatchNorm folded into w1/b1): MXU matmul, f32 accumulate ----
    h = jnp.dot(x_ref[...], w1_ref[...], preferred_element_type=jnp.float32)
    h = h + b1_ref[...]

    # ---- LeakyReLU(0.1) (VPU, f32) ----
    h = jnp.where(h > 0, h, 0.1 * h)

    # ---- Dropout(p=0.5): identity in eval mode ----

    # ---- Linear2 (H -> 1) as (1,H) x (tile_b,H)^T contraction -> (1, tile_b) ----
    # Contracting the last dims gives a lane-dense row directly (no transpose /
    # relayout needed before the store).
    out_row = lax.dot_general(
        w2_ref[...], h,
        dimension_numbers=(((1,), (1,)), ((), ())),
        preferred_element_type=jnp.float32)
    o_ref[...] = (out_row + b2_ref[0, 0]).astype(o_ref.dtype)


def fold_batchnorm(params, eps=1e-5, stream_dtype=jnp.bfloat16):
    """One-time param transform: fold eval-mode BatchNorm1d into Linear1 (cast to
    the streaming dtype), and reshape Linear2's weight into a (1, H) f32 row."""
    (w1, b1, gamma, beta, mean, var, w2, b2) = params
    scale = gamma * jax.lax.rsqrt(var + eps)                    # (1, H)
    w1f = (w1 * scale).astype(stream_dtype)                     # (D, H)
    b1f = ((b1 - mean) * scale + beta).astype(jnp.float32)      # (1, H)
    w2_row = w2.T.astype(jnp.float32)                           # (H, 1) -> (1, H)
    b2 = b2.astype(jnp.float32)                                 # (1, 1)
    return (w1f, b1f, w2_row, b2)


def class_block_pallas(x, folded_params, *, tile_b=1024,
                       vmem_limit_bytes=48 * 1024 * 1024):
    """x: (B, D), any float dtype (stream bf16 for best perf); folded_params from
    fold_batchnorm(). Returns (B, 1) f32."""
    w1f, b1f, w2_row, b2 = folded_params
    B, D = x.shape
    H = w1f.shape[1]

    # --- Batch tile selection -------------------------------------------------
    # The output is a lane-dense (1, tile_b) row per grid step, so tile_b must be
    # a multiple of 128.  Guarantee >= 2 grid steps when the batch allows it so
    # v7x's two TensorCores both get a share of the "parallel" batch grid (no-op
    # on single-TC v5e/v6e).
    #
    # VMEM budget per step (bytes), with the resident weights single-buffered:
    #   2 * tile_b * D * itemsize(x)   (double-buffered x stream)
    # +     D * H   * itemsize(w1f)    (resident, Buffered(1))
    # +     tile_b * H * 4             (h intermediate)
    # With bf16 streaming, D=2048, H=512, tile_b=1024 this is ~12 MiB, which
    # exceeds v5e's 16 MiB *scoped default* once overheads are added -> we raise
    # vmem_limit_bytes explicitly (48 MiB fits v5e/v6e's 128 MiB and leaves
    # headroom on v7x's 64 MiB physical VMEM).  On v7x with small D, tile_b can
    # be swept up to 2048-4096; re-derive the budget against 64 MiB first.
    tile_b = max(128, (int(tile_b) // 128) * 128)
    b_aligned = pl.cdiv(B, 128) * 128
    if b_aligned >= 256:
        tile_b = min(tile_b, (b_aligned // 2 // 128) * 128)
    else:
        tile_b = 128

    b_pad = pl.cdiv(B, tile_b) * tile_b
    if b_pad != B:
        # Padded tail rows compute garbage (bias/activation of zero rows) but are
        # sliced off below.
        x = jnp.pad(x, ((0, b_pad - B), (0, 0)))
    grid = (b_pad // tile_b,)

    out = pl.pallas_call(
        classblock_kernel,
        out_shape=jax.ShapeDtypeStruct((1, b_pad), jnp.float32),
        grid=grid,
        in_specs=[
            # x: streamed one batch tile per grid step (double-buffered by Pallas).
            pl.BlockSpec((tile_b, D), lambda i: (i, 0)),
            # Folded weights: constant index_map -> resident in VMEM; Buffered(1)
            # avoids keeping a useless second copy of the D*H weight.
            pl.BlockSpec((D, H), lambda i: (0, 0), pipeline_mode=pl.Buffered(1)),
            pl.BlockSpec((1, H), lambda i: (0, 0), pipeline_mode=pl.Buffered(1)),
            pl.BlockSpec((1, H), lambda i: (0, 0), pipeline_mode=pl.Buffered(1)),
            # b2 scalar lives in SMEM (no padded VMEM tile).
            pl.BlockSpec(memory_space=pltpu.MemorySpace.SMEM),
        ],
        # Lane-dense output slab: each grid step owns lanes [i*tile_b, (i+1)*tile_b).
        out_specs=pl.BlockSpec((1, tile_b), lambda i: (0, i)),
        compiler_params=pltpu.CompilerParams(
            dimension_semantics=("parallel",),
            vmem_limit_bytes=vmem_limit_bytes),
    )(x, w1f, b1f, w2_row, b2)

    return out[0, :B].reshape(B, 1)


def class_block_reference(x, params):
    """Pure-JAX f32 reference of the original (unfolded) module semantics."""
    (w1, b1, gamma, beta, mean, var, w2, b2) = params
    h = x @ w1 + b1
    h = (h - mean) * jax.lax.rsqrt(var + 1e-5) * gamma + beta
    h = jnp.where(h > 0, h, 0.1 * h)
    return h @ w2 + b2


def init_params(key, input_dim, num_bottleneck):
    k1, k2, k3 = jax.random.split(key, 3)
    # Linear1: kaiming_normal_(a=0, mode='fan_out') on weight (H, D) -> std = sqrt(2/H)
    std1 = (2.0 / num_bottleneck) ** 0.5
    w1_pt = jax.random.normal(k1, (num_bottleneck, input_dim), jnp.float32) * std1
    w1 = w1_pt.T                                  # stored (in, out)
    b1 = jnp.zeros((1, num_bottleneck), jnp.float32)
    # BatchNorm1d: weight ~ N(1, 0.02), bias = 0, running_mean = 0, running_var = 1
    gamma = (1.0 + 0.02 * jax.random.normal(k2, (num_bottleneck,), jnp.float32)
             ).reshape(1, num_bottleneck)
    beta = jnp.zeros((1, num_bottleneck), jnp.float32)
    mean = jnp.zeros((1, num_bottleneck), jnp.float32)
    var = jnp.ones((1, num_bottleneck), jnp.float32)
    # Linear2: kaiming_normal_(mode='fan_out') on weight (1, H) -> std = sqrt(2/1)
    std2 = 2.0 ** 0.5
    w2_pt = jax.random.normal(k3, (1, num_bottleneck), jnp.float32) * std2
    w2 = w2_pt.T                                  # stored (H, 1)
    b2 = jnp.zeros((1, 1), jnp.float32)
    return (w1, b1, gamma, beta, mean, var, w2, b2)


if __name__ == "__main__":
    key = jax.random.PRNGKey(0)
    kx, kp = jax.random.split(key)

    batch = 200            # not a multiple of the tile -> exercises padding + 2-step grid
    input_dim = 256
    num_bottleneck = 128   # small version of the default 512

    x = jax.random.normal(kx, (batch, input_dim), jnp.float32)
    params = init_params(kp, input_dim, num_bottleneck)
    ref = class_block_reference(x, params)

    # --- f32 path: tight numerical check of the fused kernel logic -----------
    folded_f32 = fold_batchnorm(params, stream_dtype=jnp.float32)
    out_f32 = class_block_pallas(x, folded_f32, tile_b=1024)
    out_f32 = jax.block_until_ready(out_f32)
    assert out_f32.shape == (batch, 1)
    assert jnp.allclose(out_f32, ref, atol=2e-3, rtol=2e-3), "f32 mismatch vs reference"

    # --- bf16 streaming path (performance configuration): loose check --------
    folded_bf16 = fold_batchnorm(params, stream_dtype=jnp.bfloat16)
    out_bf16 = class_block_pallas(x.astype(jnp.bfloat16), folded_bf16, tile_b=1024)
    out_bf16 = jax.block_until_ready(out_bf16)
    assert out_bf16.shape == (batch, 1)
    assert jnp.allclose(out_bf16, ref, atol=0.5, rtol=2e-2), "bf16 mismatch vs reference"

    print("KERNEL_OK")
</pallas_src>

<mosaic_0001>
module attributes {stable_mosaic.version = 11 : i64} {
  func.func @classblock_kernel(%arg0: i32, %arg1: memref<128x256xf32, #tpu.memory_space<vmem>>, %arg2: memref<256x128xf32, #tpu.memory_space<vmem>>, %arg3: memref<1x128xf32, #tpu.memory_space<vmem>>, %arg4: memref<1x128xf32, #tpu.memory_space<vmem>>, %arg5: memref<1x1xf32, #tpu.memory_space<smem>>, %arg6: memref<1x128xf32, #tpu.memory_space<vmem>>) attributes {dimension_semantics = [#tpu.dimension_semantics<parallel>], iteration_bounds = array<i64: 2>, scalar_prefetch = 0 : i64, scratch_operands = 0 : i64, tpu.core_type = #tpu.core_type<tc>, window_params = [{transform_indices = @transform_0, window_bounds = array<i64: 128, 256>}, {pipeline_mode = #tpu.pipeline_mode<synchronous>, transform_indices = @transform_1, window_bounds = array<i64: 256, 128>}, {pipeline_mode = #tpu.pipeline_mode<synchronous>, transform_indices = @transform_2, window_bounds = array<i64: 1, 128>}, {pipeline_mode = #tpu.pipeline_mode<synchronous>, transform_indices = @transform_3, window_bounds = array<i64: 1, 128>}, {transform_indices = @transform_4, window_bounds = array<i64: 1, 1>}, {transform_indices = @transform_5, window_bounds = array<i64: 1, 128>}]} {
    %c0 = arith.constant 0 : index
    %c0_0 = arith.constant 0 : index
    %0 = vector.load %arg1[%c0, %c0_0] : memref<128x256xf32, #tpu.memory_space<vmem>>, vector<128x256xf32>
    %c0_1 = arith.constant 0 : index
    %c0_2 = arith.constant 0 : index
    %1 = vector.load %arg2[%c0_1, %c0_2] : memref<256x128xf32, #tpu.memory_space<vmem>>, vector<256x128xf32>
    %cst = arith.constant dense<0.000000e+00> : vector<128x128xf32>
    %2 = tpu.matmul %0, %1, %cst {dimension_numbers = #tpu.dot_dimension_numbers<[1], [0], [0], [1], [0, 0, 1, 1], [], []>} : vector<128x256xf32>, vector<256x128xf32>, vector<128x128xf32> -> vector<128x128xf32>
    %c0_3 = arith.constant 0 : index
    %c0_4 = arith.constant 0 : index
    %3 = vector.load %arg3[%c0_3, %c0_4] : memref<1x128xf32, #tpu.memory_space<vmem>>, vector<1x128xf32>
    %4 = vector.broadcast %3 : vector<1x128xf32> to vector<128x128xf32>
    %5 = arith.addf %2, %4 : vector<128x128xf32>
    %cst_5 = arith.constant 0.000000e+00 : f32
    %6 = vector.broadcast %cst_5 : f32 to vector<128x128xf32>
    %7 = arith.cmpf ogt, %5, %6 : vector<128x128xf32>
    %cst_6 = arith.constant 1.000000e-01 : f32
    %8 = vector.broadcast %cst_6 : f32 to vector<128x128xf32>
    %9 = arith.mulf %8, %5 : vector<128x128xf32>
    %10 = arith.select %7, %5, %9 : vector<128x128xi1>, vector<128x128xf32>
    %c0_7 = arith.constant 0 : index
    %c0_8 = arith.constant 0 : index
    %11 = vector.load %arg4[%c0_7, %c0_8] : memref<1x128xf32, #tpu.memory_space<vmem>>, vector<1x128xf32>
    %cst_9 = arith.constant dense<0.000000e+00> : vector<1x128xf32>
    %12 = tpu.matmul %11, %10, %cst_9 {dimension_numbers = #tpu.dot_dimension_numbers<[1], [1], [0], [0], [0, 0, 1, 0], [], []>} : vector<1x128xf32>, vector<128x128xf32>, vector<1x128xf32> -> vector<1x128xf32>
    %c0_10 = arith.constant 0 : index
    %c0_11 = arith.constant 0 : index
    %13 = memref.load %arg5[%c0_10, %c0_11] : memref<1x1xf32, #tpu.memory_space<smem>>
    %14 = vector.broadcast %13 : f32 to vector<1x128xf32>
    %15 = arith.addf %12, %14 : vector<1x128xf32>
    %c0_12 = arith.constant 0 : index
    %c0_13 = arith.constant 0 : index
    %16 = vector.load %arg6[%c0_12, %c0_13] : memref<1x128xf32, #tpu.memory_space<vmem>>, vector<1x128xf32>
    tpu.vector_store %arg6[%c0_12, %c0_13], %15 {strides = array<i32>} : memref<1x128xf32, #tpu.memory_space<vmem>>, vector<1x128xf32>,
    return
  }
  func.func @transform_0(%arg0: i32) -> (i32, i32) {
    %c0_i32 = arith.constant 0 : i32
    %c0_i32_0 = arith.constant 0 : i32
    return %arg0, %c0_i32 : i32, i32
  }
  func.func @transform_1(%arg0: i32) -> (i32, i32) {
    %c0_i32 = arith.constant 0 : i32
    %c0_i32_0 = arith.constant 0 : i32
    %c0_i32_1 = arith.constant 0 : i32
    return %c0_i32, %c0_i32_0 : i32, i32
  }
  func.func @transform_2(%arg0: i32) -> (i32, i32) {
    %c0_i32 = arith.constant 0 : i32
    %c0_i32_0 = arith.constant 0 : i32
    %c0_i32_1 = arith.constant 0 : i32
    return %c0_i32, %c0_i32_0 : i32, i32
  }
  func.func @transform_3(%arg0: i32) -> (i32, i32) {
    %c0_i32 = arith.constant 0 : i32
    %c0_i32_0 = arith.constant 0 : i32
    %c0_i32_1 = arith.constant 0 : i32
    return %c0_i32, %c0_i32_0 : i32, i32
  }
  func.func @transform_4(%arg0: i32) -> (i32, i32) {
    %c0_i32 = arith.constant 0 : i32
    %c0_i32_0 = arith.constant 0 : i32
    %c0_i32_1 = arith.constant 0 : i32
    return %c0_i32, %c0_i32_0 : i32, i32
  }
  func.func @transform_5(%arg0: i32) -> (i32, i32) {
    %c0_i32 = arith.constant 0 : i32
    %c0_i32_0 = arith.constant 0 : i32
    return %c0_i32, %arg0 : i32, i32
  }
}

</mosaic_0001>

<bundles_post_ra>
// kernel: tpu_custom_call.1
= control target key start
LH: loop header
LB: loop body
LE: loop exit
PB: predicated region body
PF: predicated region fallthrough
CT: control target
= control target key end

     0   :  { %s1395_s0 = inlined_call_operand.hbm [shape: f32[256,256], index: 0, kind: input, shape index: {}]   ;;  %s1396_s1 = inlined_call_operand.hbm [shape: f32[256,128], index: 1, kind: input, shape index: {}]   ;;  %s1397_s2 = inlined_call_operand.vmem [shape: f32[1,128], index: 2, kind: input, shape index: {}]   ;;  %s1398_s3 = inlined_call_operand.vmem [shape: f32[1,128], index: 3, kind: input, shape index: {}]   ;;  %s1399_s4 = inlined_call_operand.<no memory space> [shape: f32[1,1], index: 4, kind: input, shape index: {}]   ;;  %s1400_s5 = inlined_call_operand.hbm [shape: f32[1,256], index: 5, kind: output, shape index: {}]  }
   0x1   :  { %10 = sst [smem:[#allocation2]] %s1399_s4 }
   0x2   :  { %11 = vsyncpa [#allocation4], 0 }
   0x3   :  { %13 = vsyncpa [#allocation4 + $0x1], 0 }
   0x4   :  { %14 = vsyncpa [#allocation7], 0 }
   0x5   :  { %15 = vsyncpa [#allocation5], 0 }
   0x6   :  { %17 = vsyncpa [#allocation5 + $0x1], 0  ;;  %s1129_s20 = smov 0   ;;  %s1131_s21 = smov 0  }
   0x7   :  { %s1133_s22 = smov 0   ;;  %s1135_s23 = smov 0  }
   0x8 LB: > { %s1150_s4 = sadd.s32 4294967295, %s1084_s23   ;;  %s687_s24 = sadd.s32 4294967294, %s1084_s23   ;;  %s1084_s23 = sphi %s1135_s23, %s1420_s23   ;;  %s1080_s22 = sphi %s1133_s22, %s1419_s22   ;;  %s1076_s21 = sphi %s1131_s21, %s1418_s21   ;;  %s1072_s20 = sphi %s1129_s20, %s1417_s20  }
   0x9   : > { %p43_p0 = scmp.ne.s32.totalorder %s1076_s21, %s1072_s20  ;;  %p1401_p1 = scmp.eq.s32.totalorder %s1150_s4, 0 }
   0xa   : > { %p157_p3 = scmp.eq.s32.totalorder %s687_s24, 1  ;;  %p688_p5 = scmp.ge.s32.totalorder %s1084_s23, 1 }
   0xb   : > { %p1159_p4 = por %p1401_p1, %p43_p0  ;;  %p164_p7 = scmp.lt.s32.totalorder %s1084_s23, 3 }
   0xc   : > { %p1164_p6 = por %p157_p3, %p43_p0  ;;  %s1086_s28 = smov [#allocation6]  }
   0xd   : > { %s1404_s25 = scalar_select %p1159_p4, 1, 0 }
   0xe   : > { %s1405_s26 = scalar_select %p1164_p6, 1, 0 }
   0xf   : > { %p1169_p8 = pnand %p688_p5, %p164_p7  ;;  %s176_s29 = sshll.u32 %s1086_s28, 4  ;;  %s1173_s29 = int_to_ptr.vmem [resolvable:$true] %s176_s29 }
  0x10   : > { %s1185_s6 = sadd.s32 1, %s1084_s23   ;;  %s30_s7 = sadd.s32 1, %s1080_s22 }
  0x11   : > { %s1406_s27 = scalar_select %p1169_p8, 1, 0 }
  0x12   : > { %p900_p9 = pneg %p1169_p8  ;;  %s27_s8 = ssub.s32 %s1084_s23, %s1185_s6 }
  0x13   : > { %s956_s11 = scalar_lea.hbm %s1396_s1, 4096 }
  0x14   : > { %p1180_p11 = pnand %p900_p9, %p1401_p1  ;;  %p957_p12 = scmp.ne.s32.totalorder %s1396_s1, %s956_s11 }
  0x15   : > { %p963_p5 = scmp.lt.u32.totalorder %s956_s11, %s1396_s1 }
  0x16   : > { %p958_p13 = pneg %p1180_p11 }
  0x18   : > { %p959_p0 = pnand %p958_p13, %p957_p12 }
  0x1a   : > { %p960_p3 = pneg %p959_p0 }
  0x1c   : > { %p965_p7 = pnand %p963_p5, %p960_p3 }
  0x1e   : > { %968 = shalt.err (!%p965_p7)
}
  0x1f   : > { %s969_s16 = scalar_lea.vmem %s1173_s29, 4096  ;;  %p977_p2 = scmp.lt.s32.totalorder %s1173_s29, %s1173_s29 }
  0x20   : > { %p970_p9 = scmp.ne.s32.totalorder %s1173_s29, %s969_s16  ;;  %p978_p6 = scmp.lt.s32.totalorder %s969_s16, %s969_s16 }
  0x22   : > { %p972_p10 = pnand %p970_p9, %p958_p13  ;;  %p979_p4 = por %p978_p6, %p977_p2 }
  0x24   : > { %p973_p1 = pneg %p972_p10 }
  0x26   : > { %p980_p8 = pnand %p979_p4, %p973_p1 }
  0x28   : > { %983 = shalt.err (!%p980_p8)
}
  0x29   : > { %s1087_s17 = smov 128   ;;  %s1088_s18 = smov 8  }
  0x2a   : > { %903 = dma.hbm_to_vmem [thread:$0]  (!%p1180_p11), %s1396_s1, 4096, %s1173_s29, [#allocation7], %s1087_s17, %s1087_s17, %s1088_s18  }
  0x2b   : > { %p28_p2 = scmp.eq.s32.totalorder %s27_s8, 0  ;;  %p37_p1 = scmp.ne.s32.totalorder %s1080_s22, %s1076_s21 }
  0x2c   : > { %p38_p4 = scmp.eq.s32.totalorder %s1084_s23, 0  ;;  %p913_p6 = scmp.lt.s32.totalorder %s1084_s23, 2 }
  0x2d   : > { %s1216_s28 = scalar_select %p28_p2, %s1080_s22, %s30_s7  }
  0x2e   : > { %p39_p8 = por %p38_p4, %p37_p1  ;;  %p1408_p10 = scmp.eq.s32.totalorder %s1150_s4, 1 }
  0x2f   : > { %s199_s10 = sand.u32 1, %s1080_s22   ;;  %s703_s11 = sshll.u32 %s1084_s23, 12 }
  0x30   : > { %p1220_p12 = por %p1408_p10, %p37_p1  ;;  %s691_s12 = sshll.u32 %s199_s10, 8 }
  0x31   : > { %s1229_s14 = scalar_lea.hbm %s1395_s0, %s703_s11  ;;  %s203_s29 = scalar_lea.vmem [#allocation3], %s691_s12 }
  0x32   : > { %s211_s7 = sshll.u32 %s203_s29, 4  ;;  %p1231_p11 = pnand %p913_p6, %p39_p8  ;;  %s1235_s7 = int_to_ptr.vmem [resolvable:$true] %s211_s7 }
  0x33   : > { %s1237_s15 = scalar_lea.sflag [#allocation4], %s199_s10  ;;  %s984_s16 = scalar_lea.hbm %s1229_s14, 4096 }
  0x34   : > { %p985_p13 = scmp.ne.s32.totalorder %s1229_s14, %s984_s16  ;;  %p986_p0 = pneg %p1231_p11 }
  0x35   : > { %s989_s19 = scalar_lea.hbm %s1395_s0, 8192  ;;  %p990_p7 = scmp.lt.u32.totalorder %s1229_s14, %s1395_s0 }
  0x36   : > { %p987_p3 = pnand %p986_p0, %p985_p13  ;;  %p991_p9 = scmp.lt.u32.totalorder %s989_s19, %s984_s16 }
  0x37   : > { %p993_p1 = scmp.lt.u32.totalorder %s984_s16, %s1229_s14 }
  0x38   : > { %p988_p5 = pneg %p987_p3  ;;  %p992_p2 = por %p991_p9, %p990_p7 }
  0x3a   : > { %p994_p4 = por %p993_p1, %p992_p2 }
  0x3c   : > { %p995_p6 = pnand %p994_p4, %p988_p5 }
  0x3e   : > { %998 = shalt.err (!%p995_p6)
}
  0x3f   : > { %s999_s10 = scalar_lea.vmem %s1235_s7, 4096  ;;  %s1089_s12 = smov [#allocation3]  }
  0x40   : > { %p1000_p8 = scmp.ne.s32.totalorder %s1235_s7, %s999_s10  ;;  %s1004_s30 = sshll.u32 %s1089_s12, 4  ;;  %s1005_s30 = int_to_ptr.vmem [resolvable:$false] %s1004_s30 }
  0x41   : > { %s1006_s13 = scalar_lea.vmem %s1005_s30, 8192  ;;  %p1007_p3 = scmp.lt.s32.totalorder %s1235_s7, %s1005_s30 }
  0x42   : > { %p1002_p10 = pnand %p1000_p8, %p986_p0  ;;  %p1008_p7 = scmp.lt.s32.totalorder %s1006_s13, %s999_s10 }
  0x44   : > { %p1003_p13 = pneg %p1002_p10  ;;  %p1009_p9 = por %p1008_p7, %p1007_p3 }
  0x46   : > { %p1010_p2 = pnand %p1009_p9, %p1003_p13 }
  0x48   : > { %1013 = shalt.err (!%p1010_p2)
}
  0x49   : > { %s1090_s29 = smov 256   ;;  %s1091_s16 = smov 16  }
  0x4a   : > { %907 = dma.hbm_to_vmem [thread:$0]  (!%p1231_p11), %s1229_s14, 4096, %s1235_s7, %s1237_s15, %s1090_s29, %s1090_s29, %s1091_s16  }
  0x4b   : > { %p1411_p0 = scmp.ne.s32.totalorder %s1406_s27, 0 }
  0x4c   : > { %s1268_s17 = sand.u32 (!%p1411_p0), 1, %s1076_s21   ;;  %p1412_p5 = scmp.ne.s32.totalorder (!%p1411_p0), %s1404_s25, 0 }
  0x4d   : > { %223 = sbr.rel (%p1411_p0) target bundleno = 640 (0x280), region = 40  ;;  %s696_s18 = sshll.u32 (!%p1411_p0), %s1268_s17, 8 }
  0x4e   : > { %s226_s19 = scalar_lea.sflag (!%p1411_p0), [#allocation4], %s1268_s17  ;;  %s1272_s24 = scalar_lea.vmem (!%p1411_p0), [#allocation3], %s696_s18 }
  0x54   : > { %1059 = dma.done.wait (%p1412_p5), %s226_s19, 4096  }
  0x55   : > { %1061 = vsyncadd (%p1412_p5), %s226_s19, 4294963200  ;;  %p1413_p11 = scmp.eq.s32.totalorder %s1150_s4, 0 }
  0x57   : > { %1063 = dma.done.wait (%p1413_p11), [#allocation7], 4096   ;;  %p1414_p1 = pmov %p1413_p11 }
  0x58   : > { %v308_v0 = vld [vmem:[#allocation6 + $0x80] sm:$0xff]  ;;  %v309_v1 = vld [vmem:[#allocation6 + $0x88] sm:$0xff]  ;;  %v310_v5 = vld [vmem:[#allocation6 + $0x90] sm:$0xff]  ;;  %vm1093_vm0 = vmmov 0   ;;  %s525_s8 = sld [smem:[#allocation2]]  ;;  %s699_s15 = sshll.u32 %s1150_s4, 4 }
  0x59   : > { %1065 = vsyncadd (%p1414_p1), [#allocation7], 4294963200  ;;  %v292_v2 = vld [vmem:[#allocation6] sm:$0xff]  ;;  %v836_v3 = vpack.c.bf16 %v309_v1, %v308_v0  ;;  %v293_v4 = vld [vmem:[#allocation6 + $0x8] sm:$0xff]  ;;  %s258_s11 = scalar_lea.vmem [#allocation8], %s1268_s17  ;;  %s1351_s13 = scalar_lea.hbm %s1400_s5, %s699_s15 }
  0x5a   : > { %v311_v6 = vld [vmem:[#allocation6 + $0x98] sm:$0xff]  ;;  %v838_v7 = vpack.c.bf16 %v293_v4, %v292_v2  ;;  %v294_v9 = vld [vmem:[#allocation6 + $0x10] sm:$0xff]  ;;  %v312_v11 = vld [vmem:[#allocation6 + $0xa0] sm:$0xff]  ;;  %s611_s10 = sshll.u32 %s258_s11, 4  ;;  %s599_s29 = scalar_lea.sflag [#allocation5], %s1268_s17  ;;  %s1353_s10 = int_to_ptr.vmem [resolvable:$true] %s611_s10 }
  0x5b   : > { %v840_v8 = vpack.c.bf16 %v311_v6, %v310_v5  ;;  %v295_v10 = vld [vmem:[#allocation6 + $0x18] sm:$0xff]  ;;  %837 = vmatprep.subr.bf16.mxu0 %v836_v3  ;;  %v313_v12 = vld [vmem:[#allocation6 + $0xa8] sm:$0xff]  ;;  %v296_v15 = vld [vmem:[#allocation6 + $0x20] sm:$0xff]  ;;  %s1014_s16 = scalar_lea.vmem %s1353_s10, 16  ;;  %s1095_s4 = smov [#allocation8]  }
  0x5c   : > { %839 = vmatpush3.bf16.msra.mxu0 %v838_v7  ;;  %v842_v13 = vpack.c.bf16 %v295_v10, %v294_v9  ;;  %v844_v14 = vpack.c.bf16 %v313_v12, %v312_v11  ;;  %v297_v16 = vld [vmem:[#allocation6 + $0x28] sm:$0xff]  ;;  %v314_v17 = vld [vmem:[#allocation6 + $0xb0] sm:$0xff]  ;;  %v315_v18 = vld [vmem:[#allocation6 + $0xb8] sm:$0xff]  ;;  %p1015_p4 = scmp.ne.s32.totalorder %s1353_s10, %s1014_s16  ;;  %s1018_s18 = sshll.u32 %s1095_s4, 4  ;;  %s1019_s18 = int_to_ptr.vmem [resolvable:$false] %s1018_s18 }
  0x5d   : > { %841 = vmatprep.subr.bf16.mxu0 %v840_v8  ;;  %v846_v19 = vpack.c.bf16 %v297_v16, %v296_v15  ;;  %v848_v20 = vpack.c.bf16 %v315_v18, %v314_v17  ;;  %v298_v21 = vld [vmem:[#allocation6 + $0x30] sm:$0xff]  ;;  %v299_v22 = vld [vmem:[#allocation6 + $0x38] sm:$0xff]  ;;  %v316_v23 = vld [vmem:[#allocation6 + $0xc0] sm:$0xff]  ;;  %v1092_v16 = vmov 0.0|0.0   ;;  %v1094_v17 = vmov 0.0   ;;  %s1020_s19 = scalar_lea.vmem %s1019_s18, 32  ;;  %p1021_p10 = scmp.lt.s32.totalorder %s1353_s10, %s1019_s18 }
  0x5e   : > { %v317_v24 = vld [vmem:[#allocation6 + $0xc8] sm:$0xff]  ;;  %v850_v26 = vpack.c.bf16 %v299_v22, %v298_v21  ;;  %v300_v28 = vld [vmem:[#allocation6 + $0x40] sm:$0xff]  ;;  %v318_v30 = vld [vmem:[#allocation6 + $0xd0] sm:$0xff]  ;;  %868 = vmatprep.subr.bf16.mxu1 %v1092_v16  ;;  %833 = vmatprep.mubr.msk.f32.mxu1 %vm1093_vm0, %v1094_v17  ;;  %p1016_p6 = pnand %p1015_p4, %p1220_p12  ;;  %p1022_p13 = scmp.lt.s32.totalorder %s1020_s19, %s1014_s16 }
  0x5f   : > { %v261_v25 = vld [vmem:[%s1272_s24 + $0x8] sm:$0xff]  ;;  %v852_v27 = vpack.c.bf16 %v317_v24, %v316_v23  ;;  %v319_v31 = vld [vmem:[#allocation6 + $0xd8] sm:$0xff]  ;;  %v302_v34 = vld [vmem:[#allocation6 + $0x50] sm:$0xff] }
  0x60   : > { %843 = vmatpush3.bf16.msra.mxu0 %v842_v13  ;;  %395 = vmatprep.mubr.f32.mxu0 %v261_v25  ;;  %v301_v29 = vld [vmem:[#allocation6 + $0x48] sm:$0xff]  ;;  %v856_v33 = vpack.c.bf16 %v319_v31, %v318_v30  ;;  %v303_v35 = vld [vmem:[#allocation6 + $0x58] sm:$0xff]  ;;  %v320_v36 = vld [vmem:[#allocation6 + $0xe0] sm:$0xff]  ;;  %p1017_p8 = pneg %p1016_p6  ;;  %p1023_p3 = por %p1022_p13, %p1021_p10 }
  0x61   : > { %845 = vmatprep.subr.bf16.mxu0 %v844_v14  ;;  %v854_v32 = vpack.c.bf16 %v301_v29, %v300_v28  ;;  %v321_v37 = vld [vmem:[#allocation6 + $0xe8] sm:$0xff]  ;;  %v858_v38 = vpack.c.bf16 %v303_v35, %v302_v34  ;;  %v304_v40 = vld [vmem:[#allocation6 + $0x60] sm:$0xff]  ;;  %v322_v42 = vld [vmem:[#allocation6 + $0xf0] sm:$0xff] }
  0x62   : > { %v860_v39 = vpack.c.bf16 %v321_v37, %v320_v36  ;;  %v305_v41 = vld [vmem:[#allocation6 + $0x68] sm:$0xff]  ;;  %v323_v43 = vld [vmem:[#allocation6 + $0xf8] sm:$0xff]  ;;  %v306_v46 = vld [vmem:[#allocation6 + $0x70] sm:$0xff]  ;;  %p1024_p7 = pnand %p1023_p3, %p1017_p8 }
  0x63   : > { %v862_v44 = vpack.c.bf16 %v305_v41, %v304_v40  ;;  %v864_v45 = vpack.c.bf16 %v323_v43, %v322_v42  ;;  %v307_v47 = vld [vmem:[#allocation6 + $0x78] sm:$0xff]  ;;  %v260_v49 = vld [vmem:[%s1272_s24] sm:$0xff]  ;;  %v262_v51 = vld [vmem:[%s1272_s24 + $0x10] sm:$0xff] }
  0x64   : > { %847 = vmatpush3.bf16.msra.mxu0 %v846_v19  ;;  %v866_v48 = vpack.c.bf16 %v307_v47, %v306_v46  ;;  %v263_v50 = vld [vmem:[%s1272_s24 + $0x18] sm:$0xff]  ;;  %v265_v52 = vld [vmem:[%s1272_s24 + $0x28] sm:$0xff]  ;;  %v264_v53 = vld [vmem:[%s1272_s24 + $0x20] sm:$0xff] }
  0x65   : > { %849 = vmatprep.subr.bf16.mxu0 %v848_v20  ;;  %v267_v54 = vld [vmem:[%s1272_s24 + $0x38] sm:$0xff]  ;;  %v266_v55 = vld [vmem:[%s1272_s24 + $0x30] sm:$0xff]  ;;  %v269_v56 = vld [vmem:[%s1272_s24 + $0x48] sm:$0xff] }
  0x66   : > { %v268_v57 = vld [vmem:[%s1272_s24 + $0x40] sm:$0xff]  ;;  %v271_v58 = vld [vmem:[%s1272_s24 + $0x58] sm:$0xff]  ;;  %v270_v59 = vld [vmem:[%s1272_s24 + $0x50] sm:$0xff] }
  0x67   : > { %v273_v60 = vld [vmem:[%s1272_s24 + $0x68] sm:$0xff]  ;;  %v272_v61 = vld [vmem:[%s1272_s24 + $0x60] sm:$0xff]  ;;  %v275_v62 = vld [vmem:[%s1272_s24 + $0x78] sm:$0xff] }
  0x68   : > { %851 = vmatpush3.bf16.msra.mxu0 %v850_v26  ;;  %v274_v63 = vld [vmem:[%s1272_s24 + $0x70] sm:$0xff]  ;;  %v277_v0 = vld [vmem:[%s1272_s24 + $0x88] sm:$0xff]  ;;  %v276_v1 = vld [vmem:[%s1272_s24 + $0x80] sm:$0xff] }
  0x69   : > { %853 = vmatprep.subr.bf16.mxu0 %v852_v27  ;;  %v279_v2 = vld [vmem:[%s1272_s24 + $0x98] sm:$0xff]  ;;  %v278_v3 = vld [vmem:[%s1272_s24 + $0x90] sm:$0xff]  ;;  %v281_v4 = vld [vmem:[%s1272_s24 + $0xa8] sm:$0xff] }
  0x6a   : > { %v280_v5 = vld [vmem:[%s1272_s24 + $0xa0] sm:$0xff]  ;;  %v283_v6 = vld [vmem:[%s1272_s24 + $0xb8] sm:$0xff]  ;;  %v282_v7 = vld [vmem:[%s1272_s24 + $0xb0] sm:$0xff] }
  0x6b   : > { %v285_v8 = vld [vmem:[%s1272_s24 + $0xc8] sm:$0xff]  ;;  %v284_v9 = vld [vmem:[%s1272_s24 + $0xc0] sm:$0xff]  ;;  %v287_v10 = vld [vmem:[%s1272_s24 + $0xd8] sm:$0xff] }
  0x6c   : > { %855 = vmatpush3.bf16.msra.mxu0 %v854_v32  ;;  %v286_v11 = vld [vmem:[%s1272_s24 + $0xd0] sm:$0xff]  ;;  %v289_v12 = vld [vmem:[%s1272_s24 + $0xe8] sm:$0xff]  ;;  %v288_v13 = vld [vmem:[%s1272_s24 + $0xe0] sm:$0xff] }
  0x6d   : > { %857 = vmatprep.subr.bf16.mxu0 %v856_v33  ;;  %v291_v14 = vld [vmem:[%s1272_s24 + $0xf8] sm:$0xff]  ;;  %v290_v15 = vld [vmem:[%s1272_s24 + $0xf0] sm:$0xff]  ;;  %v1318_v19 = vld [vmem:[%s1397_s2] ss:$0 sm:$0xff] }
  0x70   : > { %859 = vmatpush3.bf16.msra.mxu0 %v858_v38 }
  0x71   : > { %861 = vmatprep.subr.bf16.mxu0 %v860_v39 }
  0x74   : > { %863 = vmatpush3.bf16.msra.mxu0 %v862_v44 }
  0x75   : > { %865 = vmatprep.subr.bf16.mxu0 %v864_v45 }
  0x78   : > { %867 = vmatpush3.bf16.msra.mxu0 %v866_v48 }
  0x7b   : > { %396 = vmatmul.mubr.f32.vlgmr.msra.gmra.mrb[0].mxu0 %v260_v49 }
  0x7c   : > { %400 = vmatprep.mubr.f32.mxu0 %v263_v50 }
  0x7f   : > { %401 = vmatmul.mubr.f32.gmra.mrb[2].mxu0 %v262_v51 }
  0x80   : > { %405 = vmatprep.mubr.f32.mxu0 %v265_v52 }
  0x83   : > { %406 = vmatmul.mubr.f32.gmra.mrb[4].mxu0 %v264_v53 }
  0x84   : > { %410 = vmatprep.mubr.f32.mxu0 %v267_v54 }
  0x87   : > { %411 = vmatmul.mubr.f32.gmra.mrb[6].mxu0 %v266_v55 }
  0x88   : > { %415 = vmatprep.mubr.f32.mxu0 %v269_v56 }
  0x8b   : > { %416 = vmatmul.mubr.f32.gmra.mrb[8].mxu0 %v268_v57 }
  0x8c   : > { %420 = vmatprep.mubr.f32.mxu0 %v271_v58 }
  0x8f   : > { %421 = vmatmul.mubr.f32.gmra.mrb[10].mxu0 %v270_v59 }
  0x90   : > { %425 = vmatprep.mubr.f32.mxu0 %v273_v60 }
  0x93   : > { %426 = vmatmul.mubr.f32.gmra.mrb[12].mxu0 %v272_v61 }
  0x94   : > { %430 = vmatprep.mubr.f32.mxu0 %v275_v62 }
  0x97   : > { %431 = vmatmul.mubr.f32.gmra.mrb[14].mxu0 %v274_v63 }
  0x98   : > { %435 = vmatprep.mubr.f32.mxu0 %v277_v0 }
  0x9b   : > { %436 = vmatmul.mubr.f32.gmra.mrb[16].mxu0 %v276_v1 }
  0x9c   : > { %440 = vmatprep.mubr.f32.mxu0 %v279_v2 }
  0x9f   : > { %441 = vmatmul.mubr.f32.gmra.mrb[18].mxu0 %v278_v3 }
  0xa0   : > { %445 = vmatprep.mubr.f32.mxu0 %v281_v4 }
  0xa3   : > { %446 = vmatmul.mubr.f32.gmra.mrb[20].mxu0 %v280_v5 }
  0xa4   : > { %450 = vmatprep.mubr.f32.mxu0 %v283_v6 }
  0xa7   : > { %451 = vmatmul.mubr.f32.gmra.mrb[22].mxu0 %v282_v7 }
  0xa8   : > { %455 = vmatprep.mubr.f32.mxu0 %v285_v8 }
  0xab   : > { %456 = vmatmul.mubr.f32.gmra.mrb[24].mxu0 %v284_v9 }
  0xac   : > { %460 = vmatprep.mubr.f32.mxu0 %v287_v10 }
  0xaf   : > { %461 = vmatmul.mubr.f32.gmra.mrb[26].mxu0 %v286_v11 }
  0xb0   : > { %465 = vmatprep.mubr.f32.mxu0 %v289_v12 }
  0xb3   : > { %466 = vmatmul.mubr.f32.gmra.mrb[28].mxu0 %v288_v13 }
  0xb4   : > { %470 = vmatprep.mubr.f32.mxu0 %v291_v14 }
  0xb7   : > { %471 = vmatmul.mubr.f32.gmra.mrb[30].mxu0 %v290_v15 }
 0x14e   : > { %v736_v18 = vpop.f32.mrb[0].mxu0 }
 0x14f   : > { %v737_v20 = vpop.f32.mrb[1].mxu0 }
 0x150   : > { %v738_v21 = vadd.f32 %v737_v20, %v736_v18 }
 0x152   : > { %v398_v22 = vadd.f32 %v738_v21, %v1318_v19  ;;  %v739_v23 = vpop.f32.mrb[2].mxu0 }
 0x153   : > { %v740_v24 = vpop.f32.mrb[3].mxu0 }
 0x154   : > { %v741_v25 = vadd.f32 %v740_v24, %v739_v23  ;;  %v492_v28 = vmul.f32 0.1, %v398_v22  ;;  %vm476_vm1 = vcmp.gt.f32.partialorder %v398_v22, 0.0 }
 0x156   : > { %v403_v26 = vadd.f32 %v741_v25, %v1318_v19  ;;  %v742_v27 = vpop.f32.mrb[4].mxu0  ;;  %v508_v34 = vsel %vm476_vm1, %v398_v22, %v492_v28 }
 0x157   : > { %v743_v29 = vpop.f32.mrb[5].mxu0 }
 0x158   : > { %v744_v30 = vadd.f32 %v743_v29, %v742_v27  ;;  %vm477_vm2 = vcmp.gt.f32.partialorder %v403_v26, 0.0  ;;  %v493_v31 = vmul.f32 0.1, %v403_v26 }
 0x15a   : > { %v408_v32 = vadd.f32 %v744_v30, %v1318_v19  ;;  %v745_v33 = vpop.f32.mrb[6].mxu0  ;;  %v509_v35 = vsel %vm477_vm2, %v403_v26, %v493_v31 }
 0x15b   : > { %v746_v36 = vpop.f32.mrb[7].mxu0  ;;  %v869_v37 = vpack.c.bf16 %v509_v35, %v508_v34 }
 0x15c   : > { %v747_v38 = vadd.f32 %v746_v36, %v745_v33  ;;  %v494_v39 = vmul.f32 0.1, %v408_v32  ;;  %vm478_vm3 = vcmp.gt.f32.partialorder %v408_v32, 0.0 }
 0x15d   : > { %870 = vmatpush3.bf16.xpose.msra.mxu1 %v869_v37 }
 0x15e   : > { %v413_v40 = vadd.f32 %v747_v38, %v1318_v19  ;;  %v748_v41 = vpop.f32.mrb[8].mxu0  ;;  %871 = vmatprep.subr.bf16.mxu1 %v1092_v16  ;;  %v510_v47 = vsel %vm478_vm3, %v408_v32, %v494_v39 }
 0x15f   : > { %v749_v42 = vpop.f32.mrb[9].mxu0 }
 0x160   : > { %vm479_vm4 = vcmp.gt.f32.partialorder %v413_v40, 0.0  ;;  %v495_v43 = vmul.f32 0.1, %v413_v40  ;;  %v750_v44 = vadd.f32 %v749_v42, %v748_v41 }
 0x162   : > { %v418_v45 = vadd.f32 %v750_v44, %v1318_v19  ;;  %v751_v46 = vpop.f32.mrb[10].mxu0  ;;  %v511_v48 = vsel %vm479_vm4, %v413_v40, %v495_v43 }
 0x163   : > { %v752_v49 = vpop.f32.mrb[11].mxu0  ;;  %v872_v50 = vpack.c.bf16 %v511_v48, %v510_v47 }
 0x164   : > { %v753_v51 = vadd.f32 %v752_v49, %v751_v46  ;;  %v496_v52 = vmul.f32 0.1, %v418_v45  ;;  %vm480_vm5 = vcmp.gt.f32.partialorder %v418_v45, 0.0 }
 0x165   : > { %873 = vmatpush3.bf16.xpose.msra.mxu1 %v872_v50 }
 0x166   : > { %v423_v53 = vadd.f32 %v753_v51, %v1318_v19  ;;  %v754_v54 = vpop.f32.mrb[12].mxu0  ;;  %874 = vmatprep.subr.bf16.mxu1 %v1092_v16  ;;  %v512_v60 = vsel %vm480_vm5, %v418_v45, %v496_v52 }
 0x167   : > { %v755_v55 = vpop.f32.mrb[13].mxu0 }
 0x168   : > { %vm481_vm6 = vcmp.gt.f32.partialorder %v423_v53, 0.0  ;;  %v497_v56 = vmul.f32 0.1, %v423_v53  ;;  %v756_v57 = vadd.f32 %v755_v55, %v754_v54 }
 0x16a   : > { %v428_v58 = vadd.f32 %v756_v57, %v1318_v19  ;;  %v757_v59 = vpop.f32.mrb[14].mxu0  ;;  %v513_v61 = vsel %vm481_vm6, %v423_v53, %v497_v56 }
 0x16b   : > { %v758_v62 = vpop.f32.mrb[15].mxu0  ;;  %v875_v63 = vpack.c.bf16 %v513_v61, %v512_v60  ;;  %v524_v61 = vld [vmem:[%s1398_s3] sm:$0x1] }
 0x16c   : > { %v759_v0 = vadd.f32 %v758_v62, %v757_v59  ;;  %v498_v1 = vmul.f32 0.1, %v428_v58  ;;  %vm482_vm7 = vcmp.gt.f32.partialorder %v428_v58, 0.0  ;;  %v526_v62 = vstv %s525_s8 }
 0x16d   : > { %876 = vmatpush3.bf16.xpose.msra.mxu1 %v875_v63 }
 0x16e   : > { %v433_v2 = vadd.f32 %v759_v0, %v1318_v19  ;;  %v760_v3 = vpop.f32.mrb[16].mxu0  ;;  %877 = vmatprep.subr.bf16.mxu1 %v1092_v16  ;;  %v514_v9 = vsel %vm482_vm7, %v428_v58, %v498_v1 }
 0x16f   : > { %v761_v4 = vpop.f32.mrb[17].mxu0 }
 0x170   : > { %vm483_vm8 = vcmp.gt.f32.partialorder %v433_v2, 0.0  ;;  %v499_v5 = vmul.f32 0.1, %v433_v2  ;;  %v762_v6 = vadd.f32 %v761_v4, %v760_v3 }
 0x172   : > { %v438_v7 = vadd.f32 %v762_v6, %v1318_v19  ;;  %v763_v8 = vpop.f32.mrb[18].mxu0  ;;  %v515_v10 = vsel %vm483_vm8, %v433_v2, %v499_v5 }
 0x173   : > { %v764_v11 = vpop.f32.mrb[19].mxu0  ;;  %v878_v12 = vpack.c.bf16 %v515_v10, %v514_v9 }
 0x174   : > { %v765_v13 = vadd.f32 %v764_v11, %v763_v8  ;;  %v500_v14 = vmul.f32 0.1, %v438_v7  ;;  %vm484_vm9 = vcmp.gt.f32.partialorder %v438_v7, 0.0 }
 0x175   : > { %879 = vmatpush3.bf16.xpose.msra.mxu1 %v878_v12 }
 0x176   : > { %v443_v15 = vadd.f32 %v765_v13, %v1318_v19  ;;  %v766_v17 = vpop.f32.mrb[20].mxu0  ;;  %880 = vmatprep.subr.bf16.mxu1 %v1092_v16  ;;  %v516_v24 = vsel %vm484_vm9, %v438_v7, %v500_v14 }
 0x177   : > { %v767_v18 = vpop.f32.mrb[21].mxu0 }
 0x178   : > { %vm485_vm10 = vcmp.gt.f32.partialorder %v443_v15, 0.0  ;;  %v501_v20 = vmul.f32 0.1, %v443_v15  ;;  %v768_v21 = vadd.f32 %v767_v18, %v766_v17 }
 0x17a   : > { %v448_v22 = vadd.f32 %v768_v21, %v1318_v19  ;;  %v769_v23 = vpop.f32.mrb[22].mxu0  ;;  %v517_v25 = vsel %vm485_vm10, %v443_v15, %v501_v20 }
 0x17b   : > { %v770_v26 = vpop.f32.mrb[23].mxu0  ;;  %v881_v27 = vpack.c.bf16 %v517_v25, %v516_v24 }
 0x17c   : > { %v771_v28 = vadd.f32 %v770_v26, %v769_v23  ;;  %v502_v29 = vmul.f32 0.1, %v448_v22  ;;  %vm486_vm11 = vcmp.gt.f32.partialorder %v448_v22, 0.0 }
 0x17d   : > { %882 = vmatpush3.bf16.xpose.msra.mxu1 %v881_v27 }
 0x17e   : > { %v453_v30 = vadd.f32 %v771_v28, %v1318_v19  ;;  %v772_v31 = vpop.f32.mrb[24].mxu0  ;;  %883 = vmatprep.subr.bf16.mxu1 %v1092_v16  ;;  %v518_v37 = vsel %vm486_vm11, %v448_v22, %v502_v29 }
 0x17f   : > { %v773_v32 = vpop.f32.mrb[25].mxu0 }
 0x180   : > { %vm487_vm12 = vcmp.gt.f32.partialorder %v453_v30, 0.0  ;;  %v503_v33 = vmul.f32 0.1, %v453_v30  ;;  %v774_v34 = vadd.f32 %v773_v32, %v772_v31 }
 0x182   : > { %v458_v35 = vadd.f32 %v774_v34, %v1318_v19  ;;  %v775_v36 = vpop.f32.mrb[26].mxu0  ;;  %v519_v38 = vsel %vm487_vm12, %v453_v30, %v503_v33 }
 0x183   : > { %v776_v39 = vpop.f32.mrb[27].mxu0  ;;  %v884_v40 = vpack.c.bf16 %v519_v38, %v518_v37 }
 0x184   : > { %v777_v41 = vadd.f32 %v776_v39, %v775_v36  ;;  %v504_v42 = vmul.f32 0.1, %v458_v35  ;;  %vm488_vm13 = vcmp.gt.f32.partialorder %v458_v35, 0.0 }
 0x185   : > { %885 = vmatpush3.bf16.xpose.msra.mxu1 %v884_v40 }
 0x186   : > { %v463_v43 = vadd.f32 %v777_v41, %v1318_v19  ;;  %v778_v44 = vpop.f32.mrb[28].mxu0  ;;  %886 = vmatprep.subr.bf16.mxu1 %v1092_v16  ;;  %v520_v50 = vsel %vm488_vm13, %v458_v35, %v504_v42 }
 0x187   : > { %v779_v45 = vpop.f32.mrb[29].mxu0 }
 0x188   : > { %vm489_vm14 = vcmp.gt.f32.partialorder %v463_v43, 0.0  ;;  %v505_v46 = vmul.f32 0.1, %v463_v43  ;;  %v780_v47 = vadd.f32 %v779_v45, %v778_v44 }
 0x18a   : > { %v468_v48 = vadd.f32 %v780_v47, %v1318_v19  ;;  %v781_v49 = vpop.f32.mrb[30].mxu0  ;;  %v521_v51 = vsel %vm489_vm14, %v463_v43, %v505_v46 }
 0x18b   : > { %v782_v52 = vpop.f32.mrb[31].mxu0  ;;  %v887_v53 = vpack.c.bf16 %v521_v51, %v520_v50 }
 0x18c   : > { %v783_v54 = vadd.f32 %v782_v52, %v781_v49  ;;  %v506_v55 = vmul.f32 0.1, %v468_v48  ;;  %vm490_vm15 = vcmp.gt.f32.partialorder %v468_v48, 0.0 }
 0x18d   : > { %888 = vmatpush3.bf16.xpose.msra.mxu1 %v887_v53 }
 0x18e   : > { %v473_v56 = vadd.f32 %v783_v54, %v1318_v19  ;;  %889 = vmatprep.subr.bf16.mxu1 %v1092_v16  ;;  %v522_v58 = vsel %vm490_vm15, %v468_v48, %v506_v55 }
 0x190   : > { %vm491_vm0 = vcmp.gt.f32.partialorder %v473_v56, 0.0  ;;  %v507_v57 = vmul.f32 0.1, %v473_v56 }
 0x192   : > { %v523_v59 = vsel %vm491_vm0, %v473_v56, %v507_v57 }
 0x193   : > { %v890_v60 = vpack.c.bf16 %v523_v59, %v522_v58 }
 0x195   : > { %891 = vmatpush3.bf16.xpose.msra.mxu1 %v890_v60 }
 0x19c   : > { %834 = vmatmul.mubr.f32.vlgmr.msra.gmra.mrb[0].mxu1 %v524_v61 }
 0x26f   : > { %v593_v16 = vpop.f32.mrb[0].mxu1 }
 0x270   : > { %v594_v19 = vadd.f32 %v593_v16, %v526_v62  ;;  %v835_v63 = vpop.f32.mrb[1].mxu1 }
 0x272   : > { %597 = vst [vmem:[%s258_s11] sm:$0x1] %v594_v19 }
 0x273   : > { %1027 = shalt.err (!%p1024_p7)
}
 0x274   : > { %s1028_s17 = scalar_lea.hbm %s1351_s13, 16  ;;  %s1032_s27 = scalar_lea.hbm %s1400_s5, 32 }
 0x275   : > { %p1029_p9 = scmp.ne.s32.totalorder %s1351_s13, %s1028_s17  ;;  %p1033_p5 = scmp.lt.u32.totalorder %s1351_s13, %s1400_s5 }
 0x276   : > { %p1034_p11 = scmp.lt.u32.totalorder %s1032_s27, %s1028_s17  ;;  %p1036_p4 = scmp.lt.u32.totalorder %s1028_s17, %s1351_s13 }
 0x277   : > { %p1030_p2 = pnand %p1029_p9, %p1220_p12 }
 0x278   : > { %p1035_p1 = por %p1034_p11, %p1033_p5 }
 0x279   : > { %p1031_p0 = pneg %p1030_p2 }
 0x27a   : > { %p1037_p6 = por %p1036_p4, %p1035_p1 }
 0x27c   : > { %p1038_p8 = pnand %p1037_p6, %p1031_p0 }
 0x27e   : > { %1041 = shalt.err (!%p1038_p8)
}
 0x27f   : > { %898 = dma.vmem_to_hbm [thread:$0]  (%p1220_p12), %s1353_s10, 16, %s1351_s13, %s599_s29  }
 0x280 PF: > { %s623_s8 = sand.u32 1, %s1072_s20   ;;  %p1415_p10 = scmp.ne.s32.totalorder %s1405_s26, 0 }
 0x281   : > { %p1416_p13 = scmp.ge.s32.totalorder %s1084_s23, 2  ;;  %s624_s15 = scalar_lea.sflag [#allocation5], %s623_s8 }
 0x283   : > { %p909_p3 = pnand %p1416_p13, %p1415_p10 }
 0x285   : > { %1067 = dma.done.wait (!%p909_p3), %s624_s15, 16  }
 0x286   : > { %1069 = vsyncadd (!%p909_p3), %s624_s15, 4294967280  ;;  %p20_p7 = scmp.ge.s32.totalorder %s1185_s6, 4   ;;  %s1417_s20 = smov %s1076_s21 }
 0x287   : > { %s1418_s21 = smov %s1080_s22  ;;  %s1419_s22 = smov %s1216_s28 }
 0x288   : > { %s1420_s23 = smov %s1185_s6  ;;  %22 = sbr.rel (!%p20_p7) target bundleno = 8 (0x8), region = 89 }
 0x28f   :  { %628 = vsyncpa [#allocation4], 1 }
 0x290   :  { %630 = vsyncpa [#allocation4 + $0x1], 1 }
 0x291   :  { %631 = vsyncpa [#allocation7], 1 }
 0x292   :  { %632 = vsyncpa [#allocation5], 1 }
 0x293   :  { %634 = vsyncpa [#allocation5 + $0x1], 1 }

</bundles_post_ra>
